<compile_context>
chip_gen: v7x
topology: tpu7x:2x2x1
jax: 0.10.0
libtpu: 0.0.40
codegen_flags: <defaults>
</compile_context>

<pallas_src>
import functools

import jax
import jax.numpy as jnp
from jax import lax
from jax.experimental import pallas as pl
from jax.experimental.pallas import tpu as pltpu

_MASK_NONE = 0
_MASK_EXPLICIT = 1
_MASK_CAUSAL = 2


def _sdpa_kernel(q_ref, k_ref, v_ref, *rest, scale_factor, mask_bias,
                 mask_mode, tq):
    if mask_mode == _MASK_EXPLICIT:
        mask_ref, o_ref, w_ref = rest
    else:
        o_ref, w_ref = rest

    q = q_ref[...]                                   # (tq, Dk)
    if scale_factor != 1.0:
        # Fold 1/sqrt(d_k) into Q: tq*Dk VPU mults instead of tq*Sk.
        q = q * jnp.asarray(scale_factor, dtype=q.dtype)

    # scores = Q @ K^T expressed as a contraction over the shared last dim so
    # K is fed to the MXU in its natural (Sk, Dk) layout (no XLU transpose).
    scores = lax.dot_general(
        q, k_ref[...],
        dimension_numbers=(((1,), (1,)), ((), ())),
        preferred_element_type=jnp.float32)          # (tq, Sk) f32

    if mask_mode == _MASK_EXPLICIT:
        # PyTorch masked_fill_: REPLACE masked positions with mask_bias.
        m = mask_ref[...].astype(jnp.float32)        # int8 {0,1} -> f32
        scores = jnp.where(m != 0.0, jnp.float32(mask_bias), scores)
    elif mask_mode == _MASK_CAUSAL:
        # In-kernel causal mask: zero HBM bytes for the mask stream.
        row = (lax.broadcasted_iota(jnp.int32, scores.shape, 0)
               + pl.program_id(1) * tq)
        col = lax.broadcasted_iota(jnp.int32, scores.shape, 1)
        scores = jnp.where(col > row, jnp.float32(mask_bias), scores)

    # Numerically stable softmax over the key dimension.
    m_max = jnp.max(scores, axis=-1, keepdims=True)
    p = jnp.exp(scores - m_max)
    denom = jnp.sum(p, axis=-1, keepdims=True)
    # EUP approximate reciprocal (free slot) + one Newton-Raphson refinement.
    r = pl.reciprocal(denom, approx=True)
    r = r * (2.0 - denom * r)
    w = p * r                                        # (tq, Sk) f32

    # TODO(synk): dropout on attention weights not implemented (dropout_p=0.0).

    w_ref[...] = w.astype(w_ref.dtype)
    o_ref[...] = jnp.dot(w.astype(v_ref.dtype), v_ref[...],
                         preferred_element_type=jnp.float32).astype(o_ref.dtype)


def _sublane_multiple(dtype) -> int:
    itemsize = jnp.dtype(dtype).itemsize
    return {4: 8, 2: 16, 1: 32}.get(itemsize, 8)


def _vmem_capacity_bytes() -> int:
    try:
        return int(pltpu.get_tpu_info().vmem_capacity_bytes)
    except Exception:
        return 64 << 20  # conservative fallback (v7x per-TensorCore VMEM)


def scaled_dot_product_attention(q, k, v, mask=None, *, causal=False,
                                 scale=True, mask_bias=-1e9,
                                 weights_dtype=None, tq_target=256):
    """Pallas equivalent of ScaledDotProductAttention.forward(..., return_attention_weights=True)."""
    assert not (causal and mask is not None), "pass either `mask` or causal=True, not both"
    B, Sq, Dk = q.shape
    Bk, Sk, Dk2 = k.shape
    Bv, Sv, Dv = v.shape
    assert B == Bk == Bv and Dk == Dk2 and Sk == Sv

    q_dtype = q.dtype
    w_dtype = jnp.dtype(weights_dtype) if weights_dtype is not None else jnp.dtype(q_dtype)
    q_size = jnp.dtype(q_dtype).itemsize
    w_size = w_dtype.itemsize

    scale_factor = (float(Dk) ** -0.5) if scale else 1.0
    if causal:
        mask_mode = _MASK_CAUSAL
    elif mask is not None:
        mask_mode = _MASK_EXPLICIT
    else:
        mask_mode = _MASK_NONE

    # ---- tile size / VMEM budgeting (generation-aware) ---------------------
    mult = max(_sublane_multiple(q_dtype), _sublane_multiple(w_dtype))
    mask_el_bytes = 0
    if mask_mode == _MASK_EXPLICIT:
        mask_el_bytes = 1            # int8 mask stream
        mult = max(mult, 32)         # respect (32,128) int8 tiling when tiled

    # Per-step VMEM: double-buffered K/V (resident across qi), double-buffered
    # q/o/w/mask tiles, plus ~3 f32 (tq,Sk) score intermediates.
    kv_fixed = 2 * Sk * (Dk + Dv) * q_size
    per_row = (2 * (Dk * q_size + Dv * q_size + Sk * w_size + Sk * mask_el_bytes)
               + 3 * Sk * 4)
    capacity = _vmem_capacity_bytes()
    budget = int(capacity * 0.7)

    target = max(int(tq_target), mult)
    if Sq <= target and kv_fixed + Sq * per_row <= budget:
        tq = Sq                       # single full-Sq tile (full dims exempt from (8,128))
    else:
        tq = max((min(target, Sq) // mult) * mult, mult)
        while tq > mult and kv_fixed + tq * per_row > budget:
            tq -= mult

    sq_pad = (-Sq) % tq
    sq_p = Sq + sq_pad
    nq = sq_p // tq

    q_in = jnp.pad(q, ((0, 0), (0, sq_pad), (0, 0))) if sq_pad else q

    kernel = functools.partial(_sdpa_kernel,
                               scale_factor=scale_factor,
                               mask_bias=float(mask_bias),
                               mask_mode=mask_mode,
                               tq=tq)

    in_specs = [
        # Squeezed batch dim -> kernel sees clean 2-D tiles.
        pl.BlockSpec((pl.Squeezed(), tq, Dk), lambda b, qi: (b, qi, 0)),
        # K/V index_maps depend only on b: blocks stay resident (no re-DMA)
        # across the inner qi axis -- keep grid order (B, nq).
        pl.BlockSpec((pl.Squeezed(), Sk, Dk), lambda b, qi: (b, 0, 0)),
        pl.BlockSpec((pl.Squeezed(), Sk, Dv), lambda b, qi: (b, 0, 0)),
    ]
    args = [q_in, k, v]

    if mask_mode == _MASK_EXPLICIT:
        mask_arr = jnp.asarray(mask)
        if mask_arr.ndim == 2:
            # Single (Sq, Sk) mask shared across batch: index_map ignores b.
            mask_i = mask_arr.astype(jnp.int8)
            if sq_pad:
                mask_i = jnp.pad(mask_i, ((0, sq_pad), (0, 0)))
            in_specs.append(pl.BlockSpec((tq, Sk), lambda b, qi: (qi, 0)))
        else:
            mask_i = jnp.broadcast_to(mask_arr, (B, Sq, Sk)).astype(jnp.int8)
            if sq_pad:
                mask_i = jnp.pad(mask_i, ((0, 0), (0, sq_pad), (0, 0)))
            in_specs.append(
                pl.BlockSpec((pl.Squeezed(), tq, Sk), lambda b, qi: (b, qi, 0)))
        args.append(mask_i)

    out_shapes = (
        jax.ShapeDtypeStruct((B, sq_p, Dv), q_dtype),   # output
        jax.ShapeDtypeStruct((B, sq_p, Sk), w_dtype),   # attention weights
    )
    out_specs = [
        pl.BlockSpec((pl.Squeezed(), tq, Dv), lambda b, qi: (b, qi, 0)),
        pl.BlockSpec((pl.Squeezed(), tq, Sk), lambda b, qi: (b, qi, 0)),
    ]
    # TODO(synk): Dv/Sk are not padded to 128 lanes here; for tiny head dims the
    # output stores are masked (vst.msk).  Callers should fold heads so the
    # last dim is a multiple of 128 when possible.

    grid_spec = pltpu.PrefetchScalarGridSpec(
        num_scalar_prefetch=0,
        grid=(B, nq),
        in_specs=in_specs,
        out_specs=out_specs,
    )

    # Advisory cost estimate for XLA's scheduler around the custom call.
    flops = 2 * B * Sq * Sk * (Dk + Dv) + 6 * B * Sq * Sk
    bytes_accessed = (sum(int(a.size) * jnp.dtype(a.dtype).itemsize for a in args)
                      + B * sq_p * Dv * q_size + B * sq_p * Sk * w_size)
    cost = pl.CostEstimate(flops=flops,
                           transcendentals=B * Sq * Sk,
                           bytes_accessed=bytes_accessed)

    compiler_kwargs = dict(dimension_semantics=("parallel", "arbitrary"))
    vmem_needed = int((kv_fixed + tq * per_row) * 1.25)
    if vmem_needed > (16 << 20):
        # Raise the scoped VMEM limit (v5e default is only 16 MiB), clamped
        # below physical capacity (64 MiB on v7x).
        compiler_kwargs["vmem_limit_bytes"] = min(vmem_needed, int(capacity * 0.9))

    out, w = pl.pallas_call(
        kernel,
        out_shape=out_shapes,
        grid_spec=grid_spec,
        cost_estimate=cost,
        compiler_params=pltpu.CompilerParams(**compiler_kwargs),
    )(*args)

    if sq_pad:
        out = out[:, :Sq]
        w = w[:, :Sq]
    return out, w


def _reference(q, k, v, mask=None, *, scale=True, mask_bias=-1e9):
    scores = jnp.einsum("bqd,bkd->bqk", q, k).astype(jnp.float32)
    if scale:
        scores = scores * (q.shape[-1] ** -0.5)
    if mask is not None:
        scores = jnp.where(jnp.broadcast_to(mask, scores.shape), mask_bias, scores)
    w = jax.nn.softmax(scores, axis=-1)
    out = jnp.einsum("bqk,bkd->bqd", w.astype(v.dtype), v)
    return out.astype(q.dtype), w


if __name__ == "__main__":
    key = jax.random.PRNGKey(0)
    kq, kk, kv = jax.random.split(key, 3)

    B, Sq, Sk, Dk, Dv = 2, 16, 16, 32, 32
    q = jax.random.normal(kq, (B, Sq, Dk), dtype=jnp.float32)
    k = jax.random.normal(kk, (B, Sk, Dk), dtype=jnp.float32)
    v = jax.random.normal(kv, (B, Sk, Dv), dtype=jnp.float32)

    causal_mask = jnp.triu(jnp.ones((Sq, Sk), dtype=bool), k=1)

    # 1) In-kernel causal mask (no mask DMA at all), query tiling exercised
    #    (tq_target=8 -> grid (B, 2)).
    out, weights = scaled_dot_product_attention(q, k, v, causal=True, tq_target=8)
    jax.block_until_ready((out, weights))
    ref_out, ref_w = _reference(q, k, v, causal_mask)
    assert out.shape == (B, Sq, Dv) and weights.shape == (B, Sq, Sk)
    assert jnp.allclose(out, ref_out, atol=1e-4, rtol=1e-4)
    assert jnp.allclose(weights, ref_w.astype(weights.dtype), atol=1e-4, rtol=1e-4)

    # 2) Explicit (Sq, Sk) mask shared across batch, shipped as int8.
    out2, weights2 = scaled_dot_product_attention(q, k, v, causal_mask)
    jax.block_until_ready((out2, weights2))
    assert jnp.allclose(out2, ref_out, atol=1e-4, rtol=1e-4)
    assert jnp.allclose(weights2, ref_w.astype(weights2.dtype), atol=1e-4, rtol=1e-4)

    # 3) No mask, non-divisible Sq (exercises cdiv + query padding path).
    Sq2 = 12
    q3 = jax.random.normal(jax.random.PRNGKey(1), (B, Sq2, Dk), dtype=jnp.float32)
    out3, weights3 = scaled_dot_product_attention(q3, k, v, None, tq_target=8)
    jax.block_until_ready((out3, weights3))
    ref_out3, ref_w3 = _reference(q3, k, v, None)
    assert out3.shape == (B, Sq2, Dv) and weights3.shape == (B, Sq2, Sk)
    assert jnp.allclose(out3, ref_out3, atol=1e-4, rtol=1e-4)
    assert jnp.allclose(weights3, ref_w3.astype(weights3.dtype), atol=1e-4, rtol=1e-4)

    # 4) Optional bf16 attention-weights output (halves the dominant HBM stream).
    out4, weights4 = scaled_dot_product_attention(q, k, v, None,
                                                  weights_dtype=jnp.bfloat16)
    jax.block_until_ready((out4, weights4))
    ref_out4, ref_w4 = _reference(q, k, v, None)
    assert weights4.dtype == jnp.bfloat16
    assert jnp.allclose(out4, ref_out4, atol=1e-4, rtol=1e-4)
    assert jnp.allclose(weights4.astype(jnp.float32), ref_w4, atol=1e-2, rtol=1e-2)

    print("KERNEL_OK")
</pallas_src>

<mosaic_0001>
module attributes {stable_mosaic.version = 11 : i64} {
  func.func @_sdpa_kernel(%arg0: i32, %arg1: i32, %arg2: memref<1x8x32xf32, #tpu.memory_space<vmem>>, %arg3: memref<1x16x32xf32, #tpu.memory_space<vmem>>, %arg4: memref<1x16x32xf32, #tpu.memory_space<vmem>>, %arg5: memref<1x8x32xf32, #tpu.memory_space<vmem>>, %arg6: memref<1x8x16xf32, #tpu.memory_space<vmem>>) attributes {dimension_semantics = [#tpu.dimension_semantics<parallel>, #tpu.dimension_semantics<arbitrary>], iteration_bounds = array<i64: 2, 2>, scalar_prefetch = 0 : i64, scratch_operands = 0 : i64, tpu.core_type = #tpu.core_type<tc>, window_params = [{transform_indices = @transform_0, window_bounds = array<i64: 1, 8, 32>}, {transform_indices = @transform_1, window_bounds = array<i64: 1, 16, 32>}, {transform_indices = @transform_2, window_bounds = array<i64: 1, 16, 32>}, {transform_indices = @transform_3, window_bounds = array<i64: 1, 8, 32>}, {transform_indices = @transform_4, window_bounds = array<i64: 1, 8, 16>}]} {
    %c0 = arith.constant 0 : index
    %c0_0 = arith.constant 0 : index
    %c0_1 = arith.constant 0 : index
    %0 = vector.load %arg2[%c0, %c0_0, %c0_1] : memref<1x8x32xf32, #tpu.memory_space<vmem>>, vector<1x8x32xf32>
    %1 = vector.shape_cast %0 : vector<1x8x32xf32> to vector<8x32xf32>
    %cst = arith.constant 0.176776692 : f32
    %2 = vector.broadcast %cst : f32 to vector<8x32xf32>
    %3 = arith.mulf %1, %2 : vector<8x32xf32>
    %c0_2 = arith.constant 0 : index
    %c0_3 = arith.constant 0 : index
    %c0_4 = arith.constant 0 : index
    %4 = vector.load %arg3[%c0_2, %c0_3, %c0_4] : memref<1x16x32xf32, #tpu.memory_space<vmem>>, vector<1x16x32xf32>
    %5 = vector.shape_cast %4 : vector<1x16x32xf32> to vector<16x32xf32>
    %cst_5 = arith.constant dense<0.000000e+00> : vector<8x16xf32>
    %6 = tpu.matmul %3, %5, %cst_5 {dimension_numbers = #tpu.dot_dimension_numbers<[1], [1], [0], [0], [0, 0, 1, 0], [], []>} : vector<8x32xf32>, vector<16x32xf32>, vector<8x16xf32> -> vector<8x16xf32>
    %7 = tpu.iota {dimensions = array<i32: 0>} : vector<8x16xi32>
    %c8_i32 = arith.constant 8 : i32
    %8 = arith.muli %arg1, %c8_i32 : i32
    %9 = vector.broadcast %8 : i32 to vector<8x16xi32>
    %10 = arith.addi %7, %9 : vector<8x16xi32>
    %11 = tpu.iota {dimensions = array<i32: 1>} : vector<8x16xi32>
    %12 = arith.cmpi sgt, %11, %10 : vector<8x16xi32>
    %cst_6 = arith.constant -1.000000e+09 : f32
    %13 = vector.broadcast %cst_6 : f32 to vector<8x16xf32>
    %14 = arith.select %12, %13, %6 : vector<8x16xi1>, vector<8x16xf32>
    %cst_7 = arith.constant dense<0xFF800000> : vector<8xf32>
    %15 = vector.multi_reduction <maximumf>, %14, %cst_7 [1] : vector<8x16xf32> to vector<8xf32>
    %16 = vector.shape_cast %15 : vector<8xf32> to vector<8x1xf32>
    %17 = vector.broadcast %16 : vector<8x1xf32> to vector<8x16xf32>
    %18 = arith.subf %14, %17 : vector<8x16xf32>
    %19 = math.exp %18 : vector<8x16xf32>
    %cst_8 = arith.constant dense<0.000000e+00> : vector<8xf32>
    %20 = vector.multi_reduction <add>, %19, %cst_8 [1] : vector<8x16xf32> to vector<8xf32>
    %21 = vector.shape_cast %20 : vector<8xf32> to vector<8x1xf32>
    %22 = tpu.reciprocal %21 {approx = true} : vector<8x1xf32> -> vector<8x1xf32>
    %23 = arith.mulf %21, %22 : vector<8x1xf32>
    %cst_9 = arith.constant 2.000000e+00 : f32
    %24 = vector.broadcast %cst_9 : f32 to vector<8x1xf32>
    %25 = arith.subf %24, %23 : vector<8x1xf32>
    %26 = arith.mulf %22, %25 : vector<8x1xf32>
    %27 = vector.broadcast %26 : vector<8x1xf32> to vector<8x16xf32>
    %28 = arith.mulf %19, %27 : vector<8x16xf32>
    %c0_10 = arith.constant 0 : index
    %c0_11 = arith.constant 0 : index
    %c0_12 = arith.constant 0 : index
    %29 = vector.load %arg6[%c0_10, %c0_11, %c0_12] : memref<1x8x16xf32, #tpu.memory_space<vmem>>, vector<1x8x16xf32>
    %30 = vector.shape_cast %29 : vector<1x8x16xf32> to vector<8x16xf32>
    %31 = vector.shape_cast %28 : vector<8x16xf32> to vector<1x8x16xf32>
    tpu.vector_store %arg6[%c0_10, %c0_11, %c0_12], %31 {strides = array<i32>} : memref<1x8x16xf32, #tpu.memory_space<vmem>>, vector<1x8x16xf32>,
    %c0_13 = arith.constant 0 : index
    %c0_14 = arith.constant 0 : index
    %c0_15 = arith.constant 0 : index
    %32 = vector.load %arg4[%c0_13, %c0_14, %c0_15] : memref<1x16x32xf32, #tpu.memory_space<vmem>>, vector<1x16x32xf32>
    %33 = vector.shape_cast %32 : vector<1x16x32xf32> to vector<16x32xf32>
    %cst_16 = arith.constant dense<0.000000e+00> : vector<8x32xf32>
    %34 = tpu.matmul %28, %33, %cst_16 {dimension_numbers = #tpu.dot_dimension_numbers<[1], [0], [0], [1], [0, 0, 1, 1], [], []>} : vector<8x16xf32>, vector<16x32xf32>, vector<8x32xf32> -> vector<8x32xf32>
    %c0_17 = arith.constant 0 : index
    %c0_18 = arith.constant 0 : index
    %c0_19 = arith.constant 0 : index
    %35 = vector.load %arg5[%c0_17, %c0_18, %c0_19] : memref<1x8x32xf32, #tpu.memory_space<vmem>>, vector<1x8x32xf32>
    %36 = vector.shape_cast %35 : vector<1x8x32xf32> to vector<8x32xf32>
    %37 = vector.shape_cast %34 : vector<8x32xf32> to vector<1x8x32xf32>
    tpu.vector_store %arg5[%c0_17, %c0_18, %c0_19], %37 {strides = array<i32>} : memref<1x8x32xf32, #tpu.memory_space<vmem>>, vector<1x8x32xf32>,
    return
  }
  func.func @transform_0(%arg0: i32, %arg1: i32) -> (i32, i32, i32) {
    %c0_i32 = arith.constant 0 : i32
    %c0_i32_0 = arith.constant 0 : i32
    return %arg0, %arg1, %c0_i32 : i32, i32, i32
  }
  func.func @transform_1(%arg0: i32, %arg1: i32) -> (i32, i32, i32) {
    %c0_i32 = arith.constant 0 : i32
    %c0_i32_0 = arith.constant 0 : i32
    %c0_i32_1 = arith.constant 0 : i32
    return %arg0, %c0_i32, %c0_i32_0 : i32, i32, i32
  }
  func.func @transform_2(%arg0: i32, %arg1: i32) -> (i32, i32, i32) {
    %c0_i32 = arith.constant 0 : i32
    %c0_i32_0 = arith.constant 0 : i32
    %c0_i32_1 = arith.constant 0 : i32
    return %arg0, %c0_i32, %c0_i32_0 : i32, i32, i32
  }
  func.func @transform_3(%arg0: i32, %arg1: i32) -> (i32, i32, i32) {
    %c0_i32 = arith.constant 0 : i32
    %c0_i32_0 = arith.constant 0 : i32
    return %arg0, %arg1, %c0_i32 : i32, i32, i32
  }
  func.func @transform_4(%arg0: i32, %arg1: i32) -> (i32, i32, i32) {
    %c0_i32 = arith.constant 0 : i32
    %c0_i32_0 = arith.constant 0 : i32
    return %arg0, %arg1, %c0_i32 : i32, i32, i32
  }
}

</mosaic_0001>

<bundles_post_ra>
// kernel: tpu_custom_call.1
= control target key start
LH: loop header
LB: loop body
LE: loop exit
PB: predicated region body
PF: predicated region fallthrough
CT: control target
= control target key end

     0   :  { %s1580_s0 = inlined_call_operand.hbm [shape: f32[2,16,32], index: 0, kind: input, shape index: {}]   ;;  %s1581_s1 = inlined_call_operand.hbm [shape: f32[2,16,32], index: 1, kind: input, shape index: {}]   ;;  %s1582_s2 = inlined_call_operand.hbm [shape: f32[2,16,32], index: 2, kind: input, shape index: {}]   ;;  %s1583_s3 = inlined_call_operand.hbm [shape: f32[2,16,32], index: 3, kind: output, shape index: {0}]   ;;  %s1584_s4 = inlined_call_operand.hbm [shape: f32[2,16,16], index: 4, kind: output, shape index: {1}]  }
   0x1   :  { %1600 = sst [smem:[#allocation22_spill]] %s1581_s1 }
   0x2   :  { %1601 = sst [smem:[#allocation23_spill]] %s1583_s3 }
   0x3   :  { %1602 = sst [smem:[#allocation24_spill]] %s1584_s4 }
   0x4   :  { %10 = vsyncpa [#allocation3], 0 }
   0x5   :  { %12 = vsyncpa [#allocation3 + $0x1], 0 }
   0x6   :  { %13 = vsyncpa [#allocation6], 0 }
   0x7   :  { %15 = vsyncpa [#allocation6 + $0x1], 0 }
   0x8   :  { %16 = vsyncpa [#allocation4], 0 }
   0x9   :  { %18 = vsyncpa [#allocation4 + $0x1], 0 }
   0xa   :  { %19 = vsyncpa [#allocation10], 0 }
   0xb   :  { %21 = vsyncpa [#allocation10 + $0x1], 0  ;;  %s1176_s15 = smov 0   ;;  %s1178_s16 = smov 0  }
   0xc   :  { %s1180_s17 = smov 0   ;;  %s1182_s18 = smov 0  }
   0xd   :  { %s1184_s19 = smov 0   ;;  %s1186_s20 = smov 0  }
   0xe   :  { %s1188_s21 = smov 0   ;;  %s1190_s22 = smov 0  }
   0xf   :  { %s1192_s23 = smov 0   ;;  %s1194_s24 = smov 0  }
  0x10   :  { %s1196_s25 = smov 0  }
  0x11 LB: > { %1603 = sst [smem:[#allocation15_spill]] %s1123_s21  ;;  %p56_p0 = scmp.eq.s32.totalorder %s1139_s25, 0  ;;  %s1139_s25 = sphi %s1196_s25, %s27_s25   ;;  %s1135_s24 = sphi %s1194_s24, %s1648_s24   ;;  %s1131_s23 = sphi %s1192_s23, %s1647_s23   ;;  %s1127_s22 = sphi %s1190_s22, %s1646_s22   ;;  %s1123_s21 = sphi %s1188_s21, %s1645_s21   ;;  %s1119_s20 = sphi %s1186_s20, %s1644_s20   ;;  %s1115_s19 = sphi %s1184_s19, %s1643_s19   ;;  %s1111_s18 = sphi %s1182_s18, %s1642_s18   ;;  %s1107_s17 = sphi %s1180_s17, %s1641_s17   ;;  %s1103_s16 = sphi %s1178_s16, %s1640_s16   ;;  %s1099_s15 = sphi %s1176_s15, %s1639_s15  }
  0x12   : > { %1604 = sst [smem:[#allocation16_spill]] %s1127_s22  ;;  %p81_p1 = scmp.ne.s32.totalorder %s1107_s17, %s1103_s16 }
  0x13   : > { %p1585_p4 = scmp.lt.s32.totalorder %s1139_s25, 4  ;;  %s213_s26 = sand.u32 1, %s1139_s25  }
  0x14   : > { %p83_p3 = por %p81_p1, %p56_p0  ;;  %s215_s27 = sand.u32 1, %s1107_s17  }
  0x15   : > { %s1241_s28 = sshll.u32 %s215_s27, 4  ;;  %s736_s29 = sshll.u32 %s1135_s24, 8 }
  0x16   : > { %s1605_s1 = sld [smem:[#allocation22_spill]]  ;;  %s217_s7 = scalar_lea.vmem [#allocation5], %s1241_s28 }
  0x17   : > { %s224_s8 = sshll.u32 %s217_s7, 4  ;;  %p1256_p5 = pnand %p1585_p4, %p83_p3  ;;  %s1252_s8 = int_to_ptr.vmem [resolvable:$true] %s224_s8 }
  0x18   : > { %s1260_s10 = scalar_lea.sflag [#allocation6], %s213_s26 }
  0x19   : > { %p1590_p7 = pneg %p1256_p5 }
  0x1c   : > { %s1249_s6 = scalar_lea.hbm %s1605_s1, %s736_s29  ;;  %s896_s14 = scalar_lea.hbm %s1605_s1, 512 }
  0x1d   : > { %s891_s11 = scalar_lea.hbm %s1249_s6, 256  ;;  %p897_p10 = scmp.lt.u32.totalorder %s1249_s6, %s1605_s1 }
  0x1e   : > { %p892_p6 = scmp.ne.s32.totalorder %s1249_s6, %s891_s11  ;;  %p898_p11 = scmp.lt.u32.totalorder %s896_s14, %s891_s11 }
  0x1f   : > { %p900_p13 = scmp.lt.u32.totalorder %s891_s11, %s1249_s6 }
  0x20   : > { %p894_p8 = pnand %p1590_p7, %p892_p6  ;;  %p899_p12 = por %p898_p11, %p897_p10 }
  0x22   : > { %p895_p9 = pneg %p894_p8  ;;  %p901_p1 = por %p900_p13, %p899_p12 }
  0x24   : > { %p902_p3 = pnand %p901_p1, %p895_p9 }
  0x26   : > { %905 = shalt.err (!%p902_p3)
}
  0x27   : > { %s906_s26 = scalar_lea.vmem %s1252_s8, 256  ;;  %s1141_s5 = smov [#allocation5]  }
  0x28   : > { %p907_p6 = scmp.ne.s32.totalorder %s1252_s8, %s906_s26  ;;  %s911_s7 = sshll.u32 %s1141_s5, 4  ;;  %s912_s7 = int_to_ptr.vmem [resolvable:$false] %s911_s7 }
  0x29   : > { %s913_s12 = scalar_lea.vmem %s912_s7, 512  ;;  %p914_p2 = scmp.lt.s32.totalorder %s1252_s8, %s912_s7 }
  0x2a   : > { %p909_p8 = pnand %p907_p6, %p1590_p7  ;;  %p915_p10 = scmp.lt.s32.totalorder %s913_s12, %s906_s26 }
  0x2c   : > { %p910_p4 = pneg %p909_p8  ;;  %p916_p11 = por %p915_p10, %p914_p2 }
  0x2e   : > { %p917_p12 = pnand %p916_p11, %p910_p4 }
  0x30   : > { %920 = shalt.err (!%p917_p12)
}
  0x31   : > { %s1586_s11 = smov 128   ;;  %s1587_s13 = smov 8  }
  0x32   : > { %781 = dma.hbm_to_vmem [thread:$0]  (!%p1256_p5), %s1249_s6, 256, %s1252_s8, %s1260_s10, %s1586_s11, %s1586_s11, %s1587_s13  }
  0x33   : > { %s1296_s30 = scalar_lea.hbm %s1582_s2, %s736_s29  ;;  %s238_s26 = scalar_lea.vmem [#allocation7], %s1241_s28 }
  0x34   : > { %s245_s5 = sshll.u32 %s238_s26, 4  ;;  %p717_p2 = scmp.ge.s32.totalorder %s1139_s25, 1  ;;  %s1299_s5 = int_to_ptr.vmem [resolvable:$true] %s245_s5 }
  0x35   : > { %p253_p4 = scmp.lt.s32.totalorder %s1139_s25, 5  ;;  %s1308_s8 = sadd.s32 4294967295, %s1139_s25  }
  0x36   : > { %s705_s29 = sadd.s32 4294967294, %s1139_s25   ;;  %s36_s28 = sadd.s32 1, %s1131_s23 }
  0x37   : > { %p1303_p9 = pnand %p717_p2, %p253_p4  ;;  %s39_s7 = sadd.s32 1, %s1135_s24 }
  0x38   : > { %p37_p13 = scmp.ge.s32.totalorder %s36_s28, 2  ;;  %s48_s12 = sadd.s32 1, %s1119_s20 }
  0x39   : > { %s1607_s6 = scalar_select %p1303_p9, 1, 0 }
  0x3a   : > { %p55_p1 = scmp.ne.s32.totalorder %s1119_s20, %s1115_s19  ;;  %p61_p3 = scmp.ne.s32.totalorder %s1115_s19, %s1111_s18 }
  0x3b   : > { %s1650_s28 = smov (%p37_p13, %s36_s28), 0  ;;  %s1652_s7 = smov (!%p37_p13, %s39_s7), %s1135_s24 }
  0x3c   : > { %1608 = sst [smem:[#allocation17_spill]] %s1650_s28  ;;  %s44_s14 = ssub.s32 %s1131_s23, %s1650_s28 }
  0x3d   : > { %p1328_p6 = por %p56_p0, %p55_p1  ;;  %p41_p8 = scmp.ge.s32.totalorder %s1652_s7, 2 }
  0x3e   : > { %p62_p10 = scmp.eq.s32.totalorder %s1308_s8, 0  ;;  %s74_s26 = sadd.s32 1, %s1107_s17 }
  0x3f   : > { %p139_p11 = scmp.eq.s32.totalorder %s1308_s8, 3  ;;  %s1654_s7 = smov (%p41_p8, %s1652_s7), 0 }
  0x40   : > { %1610 = sst [smem:[#allocation18_spill]] %s1654_s7  ;;  %p1340_p12 = por %p62_p10, %p61_p3 }
  0x41   : > { %p1612_p0 = scmp.ne.s32.totalorder %s1103_s16, %s1099_s15  ;;  %s43_s1 = ssub.s32 %s1135_s24, %s1654_s7 }
  0x42   : > { %s1611_s11 = scalar_select %p1340_p12, 1, 0 }
  0x43   : > { %p1347_p2 = por %p1612_p0, %p62_p10  ;;  %p1356_p4 = por %p139_p11, %p55_p1 }
  0x44   : > { %s45_s3 = sor.u32 %s44_s14, %s43_s1  ;;  %p72_p13 = scmp.eq.s32.totalorder %s43_s1, 0 }
  0x45   : > { %s1613_s13 = scalar_select %p1347_p2, 1, 0 }
  0x46   : > { %s1614_s28 = scalar_select %p1356_p4, 1, 0 }
  0x47   : > { %p46_p8 = scmp.eq.s32.totalorder %s45_s3, 0  ;;  %p145_p7 = scmp.eq.s32.totalorder %s705_s29, 3 }
  0x48   : > { %1615 = sst [smem:[#allocation19_spill]] %s1614_s28  ;;  %s1596_s28 = sand.u32 1, %s1119_s20  }
  0x49   : > { %s1361_s15 = scalar_select %p72_p13, %s1107_s17, %s74_s26  }
  0x4a   : > { %s1364_s4 = scalar_select %p46_p8, %s1119_s20, %s48_s12  }
  0x4b   : > { %1616 = sst [smem:[#allocation20_spill]] %s1361_s15  ;;  %p1369_p10 = por %p145_p7, %p61_p3 }
  0x4c   : > { %1617 = sst [smem:[#allocation21_spill]] %s1364_s4  ;;  %s708_s14 = sshll.u32 %s1596_s28, 3 }
  0x4d   : > { %s1618_s7 = scalar_select %p1369_p10, 1, 0 }
  0x4e   : > { %s709_s22 = sshll.u32 %s1135_s24, 1  ;;  %s197_s3 = scalar_lea.vmem [#allocation2], %s708_s14 }
  0x4f   : > { %s202_s1 = sadd.s32 %s1131_s23, %s709_s22  ;;  %s206_s21 = sshll.u32 %s197_s3, 4  ;;  %s1378_s21 = int_to_ptr.vmem [resolvable:$true] %s206_s21 }
  0x50   : > { %s710_s29 = sshll.u32 %s202_s1, 7  ;;  %p1619_p7 = scmp.lt.s32.totalorder %s1139_s25, 4 }
  0x51   : > { %s1383_s4 = scalar_lea.hbm %s1580_s0, %s710_s29  ;;  %s921_s28 = scalar_lea.hbm %s1296_s30, 256 }
  0x52   : > { %p1389_p1 = pnand %p1619_p7, %p1328_p6  ;;  %p922_p3 = scmp.ne.s32.totalorder %s1296_s30, %s921_s28 }
  0x53   : > { %p1621_p11 = pneg %p1256_p5  ;;  %s926_s1 = scalar_lea.hbm %s1582_s2, 512 }
  0x54   : > { %p927_p8 = scmp.lt.u32.totalorder %s1296_s30, %s1582_s2  ;;  %p928_p10 = scmp.lt.u32.totalorder %s926_s1, %s921_s28 }
  0x55   : > { %p924_p0 = pnand %p922_p3, %p1621_p11  ;;  %p930_p6 = scmp.lt.u32.totalorder %s921_s28, %s1296_s30 }
  0x56   : > { %p929_p4 = por %p928_p10, %p927_p8 }
  0x57   : > { %p925_p13 = pneg %p924_p0 }
  0x58   : > { %p931_p7 = por %p930_p6, %p929_p4 }
  0x5a   : > { %p932_p2 = pnand %p931_p7, %p925_p13 }
  0x5c   : > { %935 = shalt.err (!%p932_p2)
}
  0x5d   : > { %s936_s27 = scalar_lea.vmem %s1299_s5, 256  ;;  %s1144_s29 = smov [#allocation7]  }
  0x5e   : > { %p937_p3 = scmp.ne.s32.totalorder %s1299_s5, %s936_s27  ;;  %s941_s12 = sshll.u32 %s1144_s29, 4  ;;  %s942_s12 = int_to_ptr.vmem [resolvable:$false] %s941_s12 }
  0x5f   : > { %s943_s22 = scalar_lea.vmem %s942_s12, 512  ;;  %p944_p9 = scmp.lt.s32.totalorder %s1299_s5, %s942_s12 }
  0x60   : > { %p939_p0 = pnand %p937_p3, %p1621_p11  ;;  %p945_p10 = scmp.lt.s32.totalorder %s943_s22, %s936_s27 }
  0x62   : > { %p940_p12 = pneg %p939_p0  ;;  %p946_p8 = por %p945_p10, %p944_p9 }
  0x64   : > { %p947_p4 = pnand %p946_p8, %p940_p12 }
  0x66   : > { %950 = shalt.err (!%p947_p4)
}
  0x67   : > { %s1622_s28 = smov 8   ;;  %s1623_s14 = smov 128  }
  0x68   : > { %784 = dma.hbm_to_vmem [thread:$0]  (!%p1256_p5), %s1296_s30, 256, %s1299_s5, %s1260_s10, %s1623_s14, %s1623_s14, %s1622_s28  }
  0x69   : > { %s1624_s1 = sand.u32 1, %s1119_s20   ;;  %s951_s26 = scalar_lea.hbm %s1383_s4, 128 }
  0x6a   : > { %s194_s3 = scalar_lea.sflag [#allocation3], %s1624_s1  ;;  %p952_p9 = scmp.ne.s32.totalorder %s1383_s4, %s951_s26 }
  0x6b   : > { %p953_p12 = pneg %p1389_p1  ;;  %s956_s29 = scalar_lea.hbm %s1580_s0, 512 }
  0x6c   : > { %p957_p6 = scmp.lt.u32.totalorder %s1383_s4, %s1580_s0  ;;  %p958_p7 = scmp.lt.u32.totalorder %s956_s29, %s951_s26 }
  0x6d   : > { %p954_p2 = pnand %p953_p12, %p952_p9  ;;  %p960_p3 = scmp.lt.u32.totalorder %s951_s26, %s1383_s4 }
  0x6e   : > { %p959_p5 = por %p958_p7, %p957_p6 }
  0x6f   : > { %p955_p13 = pneg %p954_p2 }
  0x70   : > { %p961_p11 = por %p960_p3, %p959_p5 }
  0x72   : > { %p962_p0 = pnand %p961_p11, %p955_p13 }
  0x74   : > { %965 = shalt.err (!%p962_p0)
}
  0x75   : > { %s966_s10 = scalar_lea.vmem %s1378_s21, 128  ;;  %s1145_s30 = smov [#allocation2]  }
  0x76   : > { %p967_p10 = scmp.ne.s32.totalorder %s1378_s21, %s966_s10  ;;  %s971_s5 = sshll.u32 %s1145_s30, 4  ;;  %s972_s5 = int_to_ptr.vmem [resolvable:$false] %s971_s5 }
  0x77   : > { %s973_s28 = scalar_lea.vmem %s972_s5, 256  ;;  %p974_p9 = scmp.lt.s32.totalorder %s1378_s21, %s972_s5 }
  0x78   : > { %p969_p8 = pnand %p967_p10, %p953_p12  ;;  %p975_p2 = scmp.lt.s32.totalorder %s973_s28, %s966_s10 }
  0x7a   : > { %p970_p4 = pneg %p969_p8  ;;  %p976_p6 = por %p975_p2, %p974_p9 }
  0x7c   : > { %p977_p7 = pnand %p976_p6, %p970_p4 }
  0x7e   : > { %980 = shalt.err (!%p977_p7)
}
  0x7f   : > { %778 = dma.hbm_to_vmem [thread:$0]  (!%p1389_p1), %s1383_s4, 128, %s1378_s21, %s194_s3  }
  0x80   : > { %p1625_p13 = scmp.ne.s32.totalorder %s1607_s6, 0 }
  0x81   : > { %s1450_s14 = sand.u32 (!%p1625_p13), 1, %s1115_s19   ;;  %p1626_p12 = scmp.ne.s32.totalorder (!%p1625_p13), %s1611_s11, 0 }
  0x82   : > { %257 = sbr.rel (%p1625_p13) target bundleno = 913 (0x391), region = 32  ;;  %s1453_s1 = sshll.u32 (!%p1625_p13), %s1450_s14, 3 }
  0x83   : > { %s260_s26 = scalar_lea.sflag (!%p1625_p13), [#allocation3], %s1450_s14  ;;  %s263_s9 = scalar_lea.vmem (!%p1625_p13), [#allocation2], %s1453_s1 }
  0x89   : > { %1082 = dma.done.wait (%p1626_p12), %s260_s26, 128  }
  0x8a   : > { %1084 = vsyncadd (%p1626_p12), %s260_s26, 4294967168  ;;  %s268_s4 = sand.u32 1, %s1308_s8   ;;  %s270_s21 = sand.u32 1, %s1103_s16  }
  0x8b   : > { %s1463_s6 = sshll.u32 %s270_s21, 4  ;;  %s269_s15 = scalar_lea.sflag [#allocation6], %s268_s4 }
  0x8c   : > { %s272_s3 = scalar_lea.vmem [#allocation5], %s1463_s6  ;;  %p1627_p1 = scmp.ne.s32.totalorder %s1613_s13, 0 }
  0x8e   : > { %1086 = dma.done.wait (%p1627_p1), %s269_s15, 512  }
  0x8f   : > { %1088 = vsyncadd (%p1627_p1), %s269_s15, 4294966784  ;;  %v1146_v0 = vmov 0.0|0.0   ;;  %s1628_s27 = sld [smem:[#allocation15_spill]]  ;;  %vm1147_vm0 = vmmov 0   ;;  %v1148_v1 = vmov 0.0   ;;  %vm325_vm1 = vcmask 261120  }
  0x90   : > { %758 = vmatprep.subr.bf16.mxu0 %v1146_v0  ;;  %748 = vmatprep.mubr.msk.f32.mxu0 %vm1147_vm0, %v1148_v1  ;;  %v323_v2 = vld [vmem:[%s272_s3] sm:$0xff]  ;;  %v324_v3 = vld [vmem:[%s272_s3 + $0x8] sm:$0xff]  ;;  %vm760_vm2 = vmpackc.low %vm325_vm1, %vm325_vm1  ;;  %v405_v7 = vlaneseq  ;;  %vm414_vm4 = vcmask 130048   ;;  %s1629_s13 = sld [smem:[#allocation16_spill]]  ;;  %s281_s8 = scalar_lea.vmem [#allocation7], %s1463_s6 }
  0x91   : > { %762 = vmatprep.subr.bf16.mxu1 %v1146_v0  ;;  %755 = vmatprep.mubr.msk.f32.mxu1 %vm1147_vm0, %v1148_v1  ;;  %v759_v4 = vpack.c.bf16 %v324_v3, %v323_v2  ;;  %v321_v5 = vld [vmem:[%s263_s9] sm:$0xff]  ;;  %v430_v21 = vld [vmem:[%s281_s8] sm:$0xff]  ;;  %s1630_s29 = sld [smem:[#allocation19_spill]]  ;;  %s320_s12 = scalar_lea.vmem [#allocation9], %s1453_s1 }
  0x92   : > { %v322_v6 = vmul.f32 0.17677669, %v321_v5  ;;  %v406_v8 = vshrl.u32 %v405_v7, 7  ;;  %v411_v11 = vand.u32 127, %v405_v7  ;;  %v431_v22 = vld [vmem:[%s281_s8 + $0x8] sm:$0xff]  ;;  %s1631_s26 = sld [smem:[#allocation24_spill]] }
  0x93   : > { %761 = vmatpush3.bf16.xpose.msk.msra.mxu0 %vm760_vm2, %v759_v4  ;;  %v763_v23 = vpack.c.bf16 %v431_v22, %v430_v21  ;;  %s542_s4 = sshll.u32 %s320_s12, 4  ;;  %s512_s21 = scalar_lea.sflag [#allocation10], %s1450_s14  ;;  %s543_s4 = int_to_ptr.vmem [resolvable:$true] %s542_s4 }
  0x94   : > { %s981_s6 = scalar_lea.vmem %s543_s4, 128  ;;  %s1149_s15 = smov [#allocation9]  }
  0x95   : > { %s726_s11 = sshll.u32 %s1628_s27, 3  ;;  %764 = vmatpush3.bf16.msra.mxu1 %v763_v23  ;;  %p982_p5 = scmp.ne.s32.totalorder %s543_s4, %s981_s6 }
  0x96   : > { %v408_v9 = vstv %s726_s11  ;;  %s730_s22 = sshll.u32 %s1629_s13, 1  ;;  %s985_s3 = sshll.u32 %s1149_s15, 4  ;;  %s986_s3 = int_to_ptr.vmem [resolvable:$false] %s985_s3 }
  0x97   : > { %v409_v10 = vadd.s32 %v408_v9, %v406_v8  ;;  %s1482_s10 = sadd.s32 %s1628_s27, %s730_s22  ;;  %p1632_p3 = scmp.ne.s32.totalorder %s1630_s29, 0 }
  0x98   : > { %s731_s30 = sshll.u32 %s1482_s10, 7  ;;  %s987_s27 = scalar_lea.vmem %s986_s3, 256 }
  0x99   : > { %vm412_vm3 = vcmp.gt.s32.totalorder %v411_v11, %v409_v10  ;;  %s1490_s9 = scalar_lea.hbm %s1631_s26, %s731_s30  ;;  %p983_p11 = pnand %p982_p5, %p1632_p3 }
  0x9a   : > { %749 = vmatmul.mubr.msk.f32.vlgmr.msra.gmra.mrb[0].mxu0 %vm325_vm1, %v322_v6  ;;  %p988_p10 = scmp.lt.s32.totalorder %s543_s4, %s986_s3  ;;  %p989_p8 = scmp.lt.s32.totalorder %s987_s27, %s981_s6 }
  0x9b   : > { %p984_p0 = pneg %p983_p11 }
  0x9c   : > { %p990_p4 = por %p989_p8, %p988_p10 }
  0x9e   : > { %p991_p9 = pnand %p990_p4, %p984_p0 }
 0x16d   : > { %v401_v12 = vpop.f32.mrb[0].mxu0 }
 0x16e   : > { %v413_v13 = vsel %vm412_vm3, -1e+09, %v401_v12  ;;  %v750_v14 = vpop.f32.mrb[1].mxu0 }
 0x16f   : > { %v415_v15 = vsel %vm414_vm4, %v413_v13, -inf }
 0x170   : > { %416 = vmax.xlane.f32.xlu0 %v415_v15 }
 0x1fd   : > { %v417_v16 = vpop.xlane.xlu0 %416 }
 0x1fe   : > { %v418_v17 = vsub.f32 %v413_v13, %v417_v16 }
 0x200   : > { %v419_v18 = vmul.f32 1.442695, %v418_v17 }
 0x202   : > { %887 = vpow2.f32 %v419_v18 }
 0x20c   : > { %v888_v19 = vpop.eup %887 }
 0x20d   : > { %v421_v20 = vsel %vm414_vm4, %v888_v19, 0.0 }
 0x20e   : > { %422 = vadd.xlane.f32.xlu0 %v421_v20 }
 0x29b   : > { %v423_v24 = vpop.xlane.xlu0 %422 }
 0x29c   : > { %889 = vrcp.f32 %v423_v24 }
 0x2a6   : > { %v890_v25 = vpop.eup %889 }
 0x2a7   : > { %v425_v26 = vmul.f32 %v890_v25, %v423_v24 }
 0x2a9   : > { %v426_v27 = vsub.f32 2.0, %v425_v26 }
 0x2ab   : > { %v427_v28 = vmul.f32 %v890_v25, %v426_v27 }
 0x2ad   : > { %v428_v29 = vmul.f32 %v888_v19, %v427_v28 }
 0x2af   : > { %756 = vmatmul.mubr.msk.f32.vlgmr.msra.gmra.mrb[0].mxu1 %vm414_vm4, %v428_v29  ;;  %429 = vst.msk [vmem:[%s320_s12] sm:$0xff] %vm414_vm4, %v428_v29 }
 0x2b0   : > { %994 = shalt.err (!%p991_p9)
}
 0x2b1   : > { %s995_s11 = scalar_lea.hbm %s1490_s9, 128  ;;  %s999_s12 = scalar_lea.hbm %s1631_s26, 512 }
 0x2b2   : > { %p996_p2 = scmp.ne.s32.totalorder %s1490_s9, %s995_s11  ;;  %p1000_p13 = scmp.lt.u32.totalorder %s1490_s9, %s1631_s26 }
 0x2b3   : > { %p1001_p12 = scmp.lt.u32.totalorder %s999_s12, %s995_s11  ;;  %p1003_p5 = scmp.lt.u32.totalorder %s995_s11, %s1490_s9 }
 0x2b4   : > { %p997_p6 = pnand %p996_p2, %p1632_p3 }
 0x2b5   : > { %p1002_p1 = por %p1001_p12, %p1000_p13 }
 0x2b6   : > { %p998_p7 = pneg %p997_p6 }
 0x2b7   : > { %p1004_p11 = por %p1003_p5, %p1002_p1 }
 0x2b9   : > { %p1005_p0 = pnand %p1004_p11, %p998_p7 }
 0x2bb   : > { %1008 = shalt.err (!%p1005_p0)
}
 0x2bc   : > { %772 = dma.vmem_to_hbm [thread:$0]  (%p1632_p3), %s543_s4, 128, %s1490_s9, %s512_s21  }
 0x2bd   : > { %s313_s28 = scalar_lea.vmem [#allocation8], %s1453_s1  ;;  %s1633_s27 = sld [smem:[#allocation23_spill]] }
 0x2be   : > { %s527_s6 = sshll.u32 %s313_s28, 4  ;;  %s507_s11 = scalar_lea.sflag [#allocation4], %s1450_s14  ;;  %s1518_s6 = int_to_ptr.vmem [resolvable:$true] %s527_s6 }
 0x2bf   : > { %s1009_s8 = scalar_lea.vmem %s1518_s6, 128  ;;  %s1150_s1 = smov [#allocation8]  }
 0x2c0   : > { %p1010_p10 = scmp.ne.s32.totalorder %s1518_s6, %s1009_s8  ;;  %s1013_s10 = sshll.u32 %s1150_s1, 4  ;;  %s1014_s10 = int_to_ptr.vmem [resolvable:$false] %s1013_s10 }
 0x2c1   : > { %p1016_p9 = scmp.lt.s32.totalorder %s1518_s6, %s1014_s10 }
 0x2c2   : > { %p1011_p8 = pnand %p1010_p10, %p1632_p3 }
 0x2c3   : > { %s1516_s13 = scalar_lea.hbm %s1633_s27, %s731_s30  ;;  %s1015_s30 = scalar_lea.vmem %s1014_s10, 256 }
 0x2c4   : > { %p1012_p4 = pneg %p1011_p8  ;;  %p1017_p2 = scmp.lt.s32.totalorder %s1015_s30, %s1009_s8 }
 0x2c6   : > { %p1018_p6 = por %p1017_p2, %p1016_p9 }
 0x2c8   : > { %p1019_p7 = pnand %p1018_p6, %p1012_p4 }
 0x382   : > { %v501_v30 = vpop.f32.mrb[0].mxu1 }
 0x383   : > { %505 = vst.msk [vmem:[%s313_s28] sm:$0xff] %vm325_vm1, %v501_v30  ;;  %v757_v31 = vpop.f32.mrb[1].mxu1 }
 0x384   : > { %1022 = shalt.err (!%p1019_p7)
}
 0x385   : > { %s1023_s14 = scalar_lea.hbm %s1516_s13, 128  ;;  %s1027_s21 = scalar_lea.hbm %s1633_s27, 512 }
 0x386   : > { %p1024_p13 = scmp.ne.s32.totalorder %s1516_s13, %s1023_s14  ;;  %p1028_p5 = scmp.lt.u32.totalorder %s1516_s13, %s1633_s27 }
 0x387   : > { %p1029_p11 = scmp.lt.u32.totalorder %s1027_s21, %s1023_s14  ;;  %p1031_p10 = scmp.lt.u32.totalorder %s1023_s14, %s1516_s13 }
 0x388   : > { %p1025_p12 = pnand %p1024_p13, %p1632_p3 }
 0x389   : > { %p1030_p0 = por %p1029_p11, %p1028_p5 }
 0x38a   : > { %p1026_p1 = pneg %p1025_p12 }
 0x38b   : > { %p1032_p8 = por %p1031_p10, %p1030_p0 }
 0x38d   : > { %p1033_p4 = pnand %p1032_p8, %p1026_p1 }
 0x38f   : > { %1036 = shalt.err (!%p1033_p4)
}
 0x390   : > { %771 = dma.vmem_to_hbm [thread:$0]  (%p1632_p3), %s1518_s6, 128, %s1516_s13, %s507_s11  }
 0x391 PF: > { %p793_p9 = scmp.ge.s32.totalorder %s1139_s25, 2  ;;  %s554_s5 = sand.u32 1, %s1111_s18  }
 0x392   : > { %p1634_p2 = scmp.ne.s32.totalorder %s1618_s7, 0  ;;  %s555_s28 = scalar_lea.sflag [#allocation4], %s554_s5 }
 0x394   : > { %p786_p6 = pnand %p793_p9, %p1634_p2 }
 0x396   : > { %1090 = dma.done.wait (!%p786_p6), %s555_s28, 128  }
 0x397   : > { %1092 = vsyncadd (!%p786_p6), %s555_s28, 4294967168  ;;  %s564_s15 = scalar_lea.sflag [#allocation10], %s554_s5 }
 0x398   : > { %1094 = dma.done.wait (!%p786_p6), %s564_s15, 128  }
 0x399   : > { %1096 = vsyncadd (!%p786_p6), %s564_s15, 4294967168  ;;  %s27_s25 = sadd.s32 1, %s1139_s25   ;;  %s1635_s29 = sld [smem:[#allocation20_spill]] }
 0x39a   : > { %p24_p7 = scmp.ge.s32.totalorder %s27_s25, 6   ;;  %s1636_s6 = sld [smem:[#allocation21_spill]] }
 0x39b   : > { %s1637_s3 = sld [smem:[#allocation17_spill]]  ;;  %s1638_s7 = sld [smem:[#allocation18_spill]] }
 0x39c   : > { %s1639_s15 = smov %s1103_s16  ;;  %s1640_s16 = smov %s1107_s17 }
 0x39d   : > { %s1642_s18 = smov %s1115_s19  ;;  %s1643_s19 = smov %s1119_s20 }
 0x39e   : > { %s1645_s21 = smov %s1131_s23  ;;  %s1646_s22 = smov %s1135_s24 }
 0x39f   : > { %s1641_s17 = smov %s1635_s29  ;;  %26 = sbr.rel (!%p24_p7) target bundleno = 17 (0x11), region = 118 }
 0x3a0   : > { %s1644_s20 = smov %s1636_s6 }
 0x3a1   : > { %s1647_s23 = smov %s1637_s3  ;;  %s1648_s24 = smov %s1638_s7 }
 0x3a6   :  { %569 = vsyncpa [#allocation3], 1 }
 0x3a7   :  { %571 = vsyncpa [#allocation3 + $0x1], 1 }
 0x3a8   :  { %572 = vsyncpa [#allocation6], 1 }
 0x3a9   :  { %574 = vsyncpa [#allocation6 + $0x1], 1 }
 0x3aa   :  { %575 = vsyncpa [#allocation4], 1 }
 0x3ab   :  { %577 = vsyncpa [#allocation4 + $0x1], 1 }
 0x3ac   :  { %578 = vsyncpa [#allocation10], 1 }
 0x3ad   :  { %580 = vsyncpa [#allocation10 + $0x1], 1 }

</bundles_post_ra>
